<compile_context>
chip_gen: v7x
topology: tpu7x:2x2x1
jax: 0.10.0
libtpu: 0.0.40
codegen_flags: <defaults>
</compile_context>

<pallas_src>
import functools

import jax
import jax.numpy as jnp
from jax.experimental import pallas as pl
from jax.experimental.pallas import tpu as pltpu


def _ada_rmsnorm_kernel(x_ref, mul_ref, add_ref, o_ref, *, inv_d, eps):
    # x_ref block: (1, TS, D); mul/add blocks: (1, 1, D)
    x = x_ref[0].astype(jnp.float32)                       # (TS, D)
    ss = jnp.sum(x * x, axis=-1, keepdims=True)            # (TS, 1)
    inv_rms = jax.lax.rsqrt(ss * inv_d + eps)              # EUP rsqrt
    out = x * inv_rms * mul_ref[0] + add_ref[0]            # broadcast (1, D)
    o_ref[0] = out.astype(o_ref.dtype)


def adaptive_rmsnorm(x, time_emb, params, *, eps=1e-5, seq_tile=512,
                     tile_bytes=2 * 1024 * 1024):
    """x: (B, S, D), time_emb: (B, D).  Returns (B, S, D)."""
    B, S, D = x.shape

    # ---- time MLP (Linear -> SiLU -> Linear) in plain XLA: tiny B x D work ----
    h = time_emb.astype(jnp.float32) @ params["w1"] + params["b1"]
    h = h * jax.nn.sigmoid(h)                               # SiLU
    time_out = h @ params["w2"] + params["b2"]              # (B, 2D)
    scale, shift = time_out[:, :D], time_out[:, D:]
    mul = (params["weight"][None, :] * (1.0 + scale)).reshape(B, 1, D)
    add = shift.reshape(B, 1, D)
    mul = mul.astype(jnp.float32)
    add = add.astype(jnp.float32)

    # ---- sequence tiling: multiple-of-8 tiles, ~tile_bytes per x tile ----
    itemsize = jnp.dtype(x.dtype).itemsize
    if S % 8 == 0:
        rows = max(8, (tile_bytes // (D * itemsize)) // 8 * 8)
        TS = min(S, seq_tile, rows)                         # multiple of 8
    else:
        # Block dim equal to the full array dim is always legal (no pad copy).
        TS = S
    grid = (B, pl.cdiv(S, TS))

    kernel = functools.partial(_ada_rmsnorm_kernel, inv_d=1.0 / D, eps=eps)

    out = pl.pallas_call(
        kernel,
        out_shape=jax.ShapeDtypeStruct((B, S, D), x.dtype),
        grid=grid,
        in_specs=[
            pl.BlockSpec((1, TS, D), lambda b, s: (b, s, 0)),   # x tile
            pl.BlockSpec((1, 1, D), lambda b, s: (b, 0, 0)),    # per-batch mul
            pl.BlockSpec((1, 1, D), lambda b, s: (b, 0, 0)),    # per-batch add
        ],
        out_specs=pl.BlockSpec((1, TS, D), lambda b, s: (b, s, 0)),
        compiler_params=pltpu.CompilerParams(
            dimension_semantics=("parallel", "parallel"),
        ),
    )(x, mul, add)

    return out


def adaptive_rmsnorm_ref(x, time_emb, params, *, eps=1e-5):
    """Pure-JAX reference mirroring the PyTorch forward."""
    D = x.shape[-1]
    h = time_emb @ params["w1"] + params["b1"]
    h = h * jax.nn.sigmoid(h)
    time_out = h @ params["w2"] + params["b2"]
    scale, shift = time_out[:, :D], time_out[:, D:]
    norm = x * jax.lax.rsqrt(jnp.mean(x * x, axis=-1, keepdims=True) + eps)
    return norm * params["weight"] * (1 + scale[:, None, :]) + shift[:, None, :]


def init_params(key, d_model):
    k1, k2, k3, k4 = jax.random.split(key, 4)
    bound1 = 1.0 / jnp.sqrt(d_model)
    return {
        # stored input-major so y = t @ W + b (equivalent to torch's y = t @ W.T + b)
        "w1": jax.random.uniform(k1, (d_model, d_model), jnp.float32, -bound1, bound1),
        "b1": jax.random.uniform(k2, (d_model,), jnp.float32, -bound1, bound1),
        "w2": jax.random.uniform(k3, (d_model, 2 * d_model), jnp.float32, -bound1, bound1),
        "b2": jax.random.uniform(k4, (2 * d_model,), jnp.float32, -bound1, bound1),
        "weight": jnp.ones((d_model,), jnp.float32),   # nn.Parameter(torch.ones(d_model))
    }


if __name__ == "__main__":
    B, S, D = 2, 8, 32
    key = jax.random.PRNGKey(0)
    kx, kt, kp = jax.random.split(key, 3)

    x = jax.random.normal(kx, (B, S, D), jnp.float32)
    time_emb = jax.random.normal(kt, (B, D), jnp.float32)
    params = init_params(kp, D)

    out = adaptive_rmsnorm(x, time_emb, params)
    out = jax.block_until_ready(out)

    ref = adaptive_rmsnorm_ref(x, time_emb, params)
    assert out.shape == (B, S, D)
    assert jnp.allclose(out, ref, atol=1e-5, rtol=1e-5), float(jnp.max(jnp.abs(out - ref)))

    print("KERNEL_OK")
</pallas_src>

<mosaic_0001>
module attributes {stable_mosaic.version = 11 : i64} {
  func.func @_ada_rmsnorm_kernel(%arg0: i32, %arg1: i32, %arg2: memref<1x8x32xf32, #tpu.memory_space<vmem>>, %arg3: memref<1x1x32xf32, #tpu.memory_space<vmem>>, %arg4: memref<1x1x32xf32, #tpu.memory_space<vmem>>, %arg5: memref<1x8x32xf32, #tpu.memory_space<vmem>>) attributes {dimension_semantics = [#tpu.dimension_semantics<parallel>, #tpu.dimension_semantics<parallel>], iteration_bounds = array<i64: 2, 1>, scalar_prefetch = 0 : i64, scratch_operands = 0 : i64, tpu.core_type = #tpu.core_type<tc>, window_params = [{transform_indices = @transform_0, window_bounds = array<i64: 1, 8, 32>}, {transform_indices = @transform_1, window_bounds = array<i64: 1, 1, 32>}, {transform_indices = @transform_2, window_bounds = array<i64: 1, 1, 32>}, {transform_indices = @transform_3, window_bounds = array<i64: 1, 8, 32>}]} {
    %c0 = arith.constant 0 : index
    %c0_0 = arith.constant 0 : index
    %c0_1 = arith.constant 0 : index
    %0 = vector.load %arg2[%c0, %c0_0, %c0_1] : memref<1x8x32xf32, #tpu.memory_space<vmem>>, vector<1x8x32xf32>
    %1 = vector.shape_cast %0 : vector<1x8x32xf32> to vector<8x32xf32>
    %2 = arith.mulf %1, %1 : vector<8x32xf32>
    %cst = arith.constant dense<0.000000e+00> : vector<8xf32>
    %3 = vector.multi_reduction <add>, %2, %cst [1] : vector<8x32xf32> to vector<8xf32>
    %4 = vector.shape_cast %3 : vector<8xf32> to vector<8x1xf32>
    %cst_2 = arith.constant 3.125000e-02 : f32
    %5 = vector.broadcast %cst_2 : f32 to vector<8x1xf32>
    %6 = arith.mulf %4, %5 : vector<8x1xf32>
    %cst_3 = arith.constant 9.99999974E-6 : f32
    %7 = vector.broadcast %cst_3 : f32 to vector<8x1xf32>
    %8 = arith.addf %6, %7 : vector<8x1xf32>
    %9 = math.rsqrt %8 : vector<8x1xf32>
    %10 = vector.broadcast %9 : vector<8x1xf32> to vector<8x32xf32>
    %11 = arith.mulf %1, %10 : vector<8x32xf32>
    %c0_4 = arith.constant 0 : index
    %c0_5 = arith.constant 0 : index
    %c0_6 = arith.constant 0 : index
    %12 = vector.load %arg3[%c0_4, %c0_5, %c0_6] : memref<1x1x32xf32, #tpu.memory_space<vmem>>, vector<1x1x32xf32>
    %13 = vector.shape_cast %12 : vector<1x1x32xf32> to vector<1x32xf32>
    %14 = vector.broadcast %13 : vector<1x32xf32> to vector<8x32xf32>
    %15 = arith.mulf %11, %14 : vector<8x32xf32>
    %c0_7 = arith.constant 0 : index
    %c0_8 = arith.constant 0 : index
    %c0_9 = arith.constant 0 : index
    %16 = vector.load %arg4[%c0_7, %c0_8, %c0_9] : memref<1x1x32xf32, #tpu.memory_space<vmem>>, vector<1x1x32xf32>
    %17 = vector.shape_cast %16 : vector<1x1x32xf32> to vector<1x32xf32>
    %18 = vector.broadcast %17 : vector<1x32xf32> to vector<8x32xf32>
    %19 = arith.addf %15, %18 : vector<8x32xf32>
    %c0_10 = arith.constant 0 : index
    %c0_11 = arith.constant 0 : index
    %c0_12 = arith.constant 0 : index
    %20 = vector.load %arg5[%c0_10, %c0_11, %c0_12] : memref<1x8x32xf32, #tpu.memory_space<vmem>>, vector<1x8x32xf32>
    %21 = vector.shape_cast %20 : vector<1x8x32xf32> to vector<8x32xf32>
    %22 = vector.shape_cast %19 : vector<8x32xf32> to vector<1x8x32xf32>
    tpu.vector_store %arg5[%c0_10, %c0_11, %c0_12], %22 {strides = array<i32>} : memref<1x8x32xf32, #tpu.memory_space<vmem>>, vector<1x8x32xf32>,
    return
  }
  func.func @transform_0(%arg0: i32, %arg1: i32) -> (i32, i32, i32) {
    %c0_i32 = arith.constant 0 : i32
    %c0_i32_0 = arith.constant 0 : i32
    return %arg0, %arg1, %c0_i32 : i32, i32, i32
  }
  func.func @transform_1(%arg0: i32, %arg1: i32) -> (i32, i32, i32) {
    %c0_i32 = arith.constant 0 : i32
    %c0_i32_0 = arith.constant 0 : i32
    %c0_i32_1 = arith.constant 0 : i32
    return %arg0, %c0_i32, %c0_i32_0 : i32, i32, i32
  }
  func.func @transform_2(%arg0: i32, %arg1: i32) -> (i32, i32, i32) {
    %c0_i32 = arith.constant 0 : i32
    %c0_i32_0 = arith.constant 0 : i32
    %c0_i32_1 = arith.constant 0 : i32
    return %arg0, %c0_i32, %c0_i32_0 : i32, i32, i32
  }
  func.func @transform_3(%arg0: i32, %arg1: i32) -> (i32, i32, i32) {
    %c0_i32 = arith.constant 0 : i32
    %c0_i32_0 = arith.constant 0 : i32
    return %arg0, %arg1, %c0_i32 : i32, i32, i32
  }
}

</mosaic_0001>

<bundles_post_ra>
// kernel: tpu_custom_call.1
= control target key start
LH: loop header
LB: loop body
LE: loop exit
PB: predicated region body
PF: predicated region fallthrough
CT: control target
= control target key end

     0   :  { %8 = vsyncpa [#allocation3], 0  ;;  %s768_s0 = inlined_call_operand.hbm [shape: f32[2,8,32], index: 0, kind: input, shape index: {}]   ;;  %s769_s1 = inlined_call_operand.vmem [shape: f32[2,1,32], index: 1, kind: input, shape index: {}]   ;;  %s770_s2 = inlined_call_operand.vmem [shape: f32[2,1,32], index: 2, kind: input, shape index: {}]   ;;  %s771_s3 = inlined_call_operand.hbm [shape: f32[2,8,32], index: 3, kind: output, shape index: {}]  }
   0x1   :  { %10 = vsyncpa [#allocation3 + $0x1], 0 }
   0x2   :  { %11 = vsyncpa [#allocation4], 0 }
   0x3   :  { %13 = vsyncpa [#allocation4 + $0x1], 0  ;;  %s586_s12 = smov 0   ;;  %s588_s13 = smov 0  }
   0x4   :  { %s590_s14 = smov 0   ;;  %s592_s15 = smov 0  }
   0x5   :  { %s594_s16 = smov 0   ;;  %s596_s17 = smov 0  }
   0x6 LB: > { %s371_s18 = sadd.s32 4294967295, %s562_s17   ;;  %s372_s19 = sadd.s32 4294967294, %s562_s17   ;;  %s562_s17 = sphi %s596_s17, %s19_s17   ;;  %s558_s16 = sphi %s594_s16, %s787_s16   ;;  %s554_s15 = sphi %s592_s15, %s786_s15   ;;  %s550_s14 = sphi %s590_s14, %s785_s14   ;;  %s546_s13 = sphi %s588_s13, %s784_s13   ;;  %s542_s12 = sphi %s586_s12, %s783_s12  }
   0x7   : > { %s31_s20 = sadd.s32 1, %s558_s16  ;;  %s40_s21 = sadd.s32 1, %s550_s14 }
   0x8   : > { %p33_p0 = scmp.ge.s32.totalorder %s31_s20, 2  ;;  %p47_p1 = scmp.ne.s32.totalorder %s550_s14, %s546_s13 }
   0x9   : > { %p48_p2 = scmp.eq.s32.totalorder %s562_s17, 0  ;;  %p53_p3 = scmp.ne.s32.totalorder %s546_s13, %s542_s12 }
   0xa   : > { %s789_s20 = smov (%p33_p0, %s31_s20), 0  ;;  %p54_p5 = scmp.eq.s32.totalorder %s371_s18, 0 }
   0xb   : > { %p627_p4 = por %p48_p2, %p47_p1  ;;  %s35_s23 = ssub.s32 %s558_s16, %s789_s20 }
   0xc   : > { %p131_p6 = scmp.eq.s32.totalorder %s371_s18, 1  ;;  %p38_p7 = scmp.eq.s32.totalorder %s35_s23, 0 }
   0xd   : > { %p633_p8 = por %p54_p5, %p53_p3  ;;  %p137_p10 = scmp.eq.s32.totalorder %s372_s19, 1 }
   0xe   : > { %p637_p9 = por %p131_p6, %p47_p1  ;;  %p398_p13 = scmp.lt.s32.totalorder %s562_s17, 2 }
   0xf   : > { %s642_s26 = scalar_select %p38_p7, %s550_s14, %s40_s21  }
  0x10   : > { %s775_s25 = scalar_select %p637_p9, 1, 0 }
  0x11   : > { %p644_p11 = por %p137_p10, %p53_p3  ;;  %s157_s28 = sand.u32 1, %s550_s14  }
  0x12   : > { %s375_s29 = sshll.u32 %s157_s28, 3  ;;  %s376_s30 = sshll.u32 %s558_s16, 7 }
  0x13   : > { %s776_s27 = scalar_select %p644_p11, 1, 0 }
  0x14   : > { %s655_s6 = scalar_lea.hbm %s768_s0, %s376_s30  ;;  %s161_s7 = scalar_lea.vmem [#allocation2], %s375_s29 }
  0x15   : > { %s169_s8 = sshll.u32 %s161_s7, 4  ;;  %p661_p0 = pnand %p398_p13, %p627_p4  ;;  %s657_s8 = int_to_ptr.vmem [resolvable:$true] %s169_s8 }
  0x16   : > { %s158_s10 = scalar_lea.sflag [#allocation3], %s157_s28  ;;  %s450_s11 = scalar_lea.hbm %s655_s6, 128 }
  0x17   : > { %p451_p3 = scmp.ne.s32.totalorder %s655_s6, %s450_s11  ;;  %p452_p5 = pneg %p661_p0 }
  0x18   : > { %s455_s21 = scalar_lea.hbm %s768_s0, 256  ;;  %p456_p4 = scmp.lt.u32.totalorder %s655_s6, %s768_s0 }
  0x19   : > { %p453_p6 = pnand %p452_p5, %p451_p3  ;;  %p457_p10 = scmp.lt.u32.totalorder %s455_s21, %s450_s11 }
  0x1a   : > { %p459_p12 = scmp.lt.u32.totalorder %s450_s11, %s655_s6 }
  0x1b   : > { %p454_p7 = pneg %p453_p6  ;;  %p458_p13 = por %p457_p10, %p456_p4 }
  0x1d   : > { %p460_p1 = por %p459_p12, %p458_p13 }
  0x1f   : > { %p461_p2 = pnand %p460_p1, %p454_p7 }
  0x21   : > { %464 = shalt.err (!%p461_p2)
}
  0x22   : > { %s465_s28 = scalar_lea.vmem %s657_s8, 128  ;;  %s564_s29 = smov [#allocation2]  }
  0x23   : > { %p466_p3 = scmp.ne.s32.totalorder %s657_s8, %s465_s28  ;;  %s470_s30 = sshll.u32 %s564_s29, 4  ;;  %s471_s30 = int_to_ptr.vmem [resolvable:$false] %s470_s30 }
  0x24   : > { %s472_s4 = scalar_lea.vmem %s471_s30, 256  ;;  %p473_p9 = scmp.lt.s32.totalorder %s657_s8, %s471_s30 }
  0x25   : > { %p468_p6 = pnand %p466_p3, %p452_p5  ;;  %p474_p4 = scmp.lt.s32.totalorder %s472_s4, %s465_s28 }
  0x27   : > { %p469_p11 = pneg %p468_p6  ;;  %p475_p10 = por %p474_p4, %p473_p9 }
  0x29   : > { %p476_p12 = pnand %p475_p10, %p469_p11 }
  0x2b   : > { %479 = shalt.err (!%p476_p12)
}
  0x2c   : > { %393 = dma.hbm_to_vmem [thread:$0]  (!%p661_p0), %s655_s6, 128, %s657_s8, %s158_s10  }
  0x2d   : > { %p778_p1 = scmp.lt.s32.totalorder %s562_s17, 3  ;;  %p779_p2 = scmp.ge.s32.totalorder %s562_s17, 1 }
  0x2f   : > { %p187_p5 = pnand %p779_p2, %p778_p1 }
  0x30   : > { %s697_s5 = sand.u32 (!%p187_p5), 1, %s546_s13  }
  0x31   : > { %190 = sbr.rel (%p187_p5) target bundleno = 238 (0xee), region = 32  ;;  %s378_s7 = sshll.u32 (!%p187_p5), %s697_s5, 3 }
  0x32   : > { %s193_s11 = scalar_lea.sflag (!%p187_p5), [#allocation3], %s697_s5  ;;  %s196_s18 = scalar_lea.vmem (!%p187_p5), [#allocation2], %s378_s7 }
  0x38   : > { %533 = dma.done.wait (%p633_p8), %s193_s11, 128  }
  0x39   : > { %535 = vsyncadd (%p633_p8), %s193_s11, 4294967168  ;;  %v231_v0 = vld [vmem:[%s196_s18] sm:$0xff]  ;;  %vm233_vm0 = vcmask 261120   ;;  %p225_p9 = scmp.lt.s32.totalorder %s554_s15, 1  ;;  %s383_s22 = sshll.u32 %s554_s15, 7 }
  0x3a   : > { %v232_v1 = vmul.f32 %v231_v0, %v231_v0  ;;  %s224_s23 = scalar_lea.vmem [#allocation5], %s378_s7  ;;  %s718_s4 = scalar_lea.hbm %s771_s3, %s383_s22 }
  0x3b   : > { %s226_s6 = scalar_select %p225_p9, %s554_s15, 1 }
  0x3c   : > { %v234_v2 = vsel %vm233_vm0, %v232_v1, 0.0  ;;  %s273_s28 = sshll.u32 %s224_s23, 4  ;;  %s259_s11 = scalar_lea.sflag [#allocation4], %s697_s5  ;;  %s720_s28 = int_to_ptr.vmem [resolvable:$true] %s273_s28 }
  0x3d   : > { %235 = vadd.xlane.f32.xlu0 %v234_v2  ;;  %s227_s24 = scalar_lea.vmem %s769_s1, %s226_s6  ;;  %s230_s21 = scalar_lea.vmem %s770_s2, %s226_s6 }
  0x3e   : > { %v380_v7 = vld [vmem:[%s227_s24] ss:$0 sm:$0xff]  ;;  %s480_s18 = scalar_lea.vmem %s720_s28, 128  ;;  %p780_p11 = scmp.ne.s32.totalorder %s775_s25, 0 }
  0x3f   : > { %v381_v9 = vld [vmem:[%s230_s21] ss:$0 sm:$0xff]  ;;  %p481_p8 = scmp.ne.s32.totalorder %s720_s28, %s480_s18  ;;  %s565_s15 = smov [#allocation5]  }
  0x40   : > { %s484_s7 = sshll.u32 %s565_s15, 4  ;;  %s485_s7 = int_to_ptr.vmem [resolvable:$false] %s484_s7 }
  0x41   : > { %p482_p0 = pnand %p481_p8, %p780_p11  ;;  %s486_s6 = scalar_lea.vmem %s485_s7, 256 }
  0x42   : > { %p487_p13 = scmp.lt.s32.totalorder %s720_s28, %s485_s7  ;;  %p488_p3 = scmp.lt.s32.totalorder %s486_s6, %s480_s18 }
  0x43   : > { %p483_p7 = pneg %p482_p0 }
  0x44   : > { %p489_p6 = por %p488_p3, %p487_p13 }
  0x46   : > { %p490_p4 = pnand %p489_p6, %p483_p7 }
  0xca   : > { %v236_v3 = vpop.xlane.xlu0 %235 }
  0xcb   : > { %v237_v4 = vmul.f32 0.03125, %v236_v3 }
  0xcd   : > { %v238_v5 = vadd.f32 1e-05, %v237_v4 }
  0xcf   : > { %448 = vrsqrt.f32 %v238_v5 }
  0xd9   : > { %v449_v6 = vpop.eup %448 }
  0xda   : > { %v240_v8 = vmul.f32 %v449_v6, %v231_v0 }
  0xdc   : > { %v248_v10 = vmul.f32 %v380_v7, %v240_v8 }
  0xde   : > { %v256_v11 = vadd.f32 %v381_v9, %v248_v10 }
  0xe0   : > { %257 = vst.msk [vmem:[%s224_s23] sm:$0xff] %vm233_vm0, %v256_v11 }
  0xe1   : > { %493 = shalt.err (!%p490_p4)
}
  0xe2   : > { %s494_s5 = scalar_lea.hbm %s718_s4, 128  ;;  %s498_s24 = scalar_lea.hbm %s771_s3, 256 }
  0xe3   : > { %p495_p10 = scmp.ne.s32.totalorder %s718_s4, %s494_s5  ;;  %p499_p2 = scmp.lt.u32.totalorder %s718_s4, %s771_s3 }
  0xe4   : > { %p500_p5 = scmp.lt.u32.totalorder %s498_s24, %s494_s5  ;;  %p502_p8 = scmp.lt.u32.totalorder %s494_s5, %s718_s4 }
  0xe5   : > { %p496_p12 = pnand %p495_p10, %p780_p11 }
  0xe6   : > { %p501_p9 = por %p500_p5, %p499_p2 }
  0xe7   : > { %p497_p1 = pneg %p496_p12 }
  0xe8   : > { %p503_p0 = por %p502_p8, %p501_p9 }
  0xea   : > { %p504_p7 = pnand %p503_p0, %p497_p1 }
  0xec   : > { %507 = shalt.err (!%p504_p7)
}
  0xed   : > { %388 = dma.vmem_to_hbm [thread:$0]  (%p780_p11), %s720_s28, 128, %s718_s4, %s259_s11  }
  0xee PF: > { %s285_s21 = sand.u32 1, %s542_s12   ;;  %p781_p13 = scmp.ne.s32.totalorder %s776_s27, 0 }
  0xef   : > { %p782_p3 = scmp.ge.s32.totalorder %s562_s17, 2  ;;  %s286_s22 = scalar_lea.sflag [#allocation4], %s285_s21 }
  0xf1   : > { %p395_p6 = pnand %p782_p3, %p781_p13 }
  0xf3   : > { %537 = dma.done.wait (!%p395_p6), %s286_s22, 128  }
  0xf4   : > { %539 = vsyncadd (!%p395_p6), %s286_s22, 4294967168  ;;  %s19_s17 = sadd.s32 1, %s562_s17   ;;  %s783_s12 = smov %s546_s13 }
  0xf5   : > { %p16_p4 = scmp.ge.s32.totalorder %s19_s17, 4   ;;  %s784_s13 = smov %s550_s14 }
  0xf6   : > { %s785_s14 = smov %s642_s26  ;;  %s786_s15 = smov %s558_s16 }
  0xf7   : > { %s787_s16 = smov %s789_s20  ;;  %18 = sbr.rel (!%p16_p4) target bundleno = 6 (0x6), region = 83 }
  0xfe   :  { %291 = vsyncpa [#allocation3], 1 }
  0xff   :  { %293 = vsyncpa [#allocation3 + $0x1], 1 }
 0x100   :  { %294 = vsyncpa [#allocation4], 1 }
 0x101   :  { %296 = vsyncpa [#allocation4 + $0x1], 1 }

</bundles_post_ra>
